<compile_context>
chip_gen: v7x
topology: tpu7x:2x2x1
jax: 0.10.0
libtpu: 0.0.40
codegen_flags: <defaults>
</compile_context>

<pallas_src>
import math

import jax
import jax.numpy as jnp
from jax import lax
from jax.experimental import pallas as pl
from jax.experimental.pallas import tpu as pltpu


# --------------------------- stage 1 / 3: linear kernel ---------------------------
def _linear_kernel(x_ref, w_ref, b_ref, o_ref, acc_ref):
    """One (rb, tk) x (tk, N) MXU step of y = x @ w + b (f32 accumulation)."""

    @pl.when(pl.program_id(1) == 0)
    def _():
        acc_ref[...] = jnp.zeros_like(acc_ref)

    acc_ref[...] += jnp.dot(x_ref[...], w_ref[...],
                            preferred_element_type=jnp.float32)

    @pl.when(pl.program_id(1) == pl.num_programs(1) - 1)
    def _():
        o_ref[...] = (acc_ref[...] + b_ref[...]).astype(o_ref.dtype)


def _largest_divisor(n, candidates):
    for c in candidates:
        if n % c == 0:
            return c
    return n


def _linear(x2d, w, b, out_dtype):
    """y = x2d @ w + b.  x2d: (R, K) bf16, w: (K, N) bf16, b: (1, N) f32
    (zeros for bias-less layers).  Rows / contraction are tiled; the output
    width N stays whole so every MXU result and store is lane-dense."""
    R, K = x2d.shape
    N = w.shape[1]
    rb = _largest_divisor(R, (256, 128, 64, 32, 16, 8))
    tk = _largest_divisor(K, (512, 256, 128))
    return pl.pallas_call(
        _linear_kernel,
        out_shape=jax.ShapeDtypeStruct((R, N), out_dtype),
        grid=(R // rb, K // tk),
        in_specs=[
            pl.BlockSpec((rb, tk), lambda i, k: (i, k)),
            pl.BlockSpec((tk, N), lambda i, k: (k, 0)),
            pl.BlockSpec((1, N), lambda i, k: (0, 0)),
        ],
        out_specs=pl.BlockSpec((rb, N), lambda i, k: (i, 0)),
        scratch_shapes=[pltpu.VMEM((rb, N), jnp.float32)],
        compiler_params=pltpu.CompilerParams(
            dimension_semantics=("parallel", "arbitrary")),
    )(x2d, w, b)


# ------------------------------ stage 2: attention core ---------------------------
def _attention_kernel(q_ref, k_ref, v_ref, p_ref, u_ref, vb_ref, o_ref):
    f32 = jnp.float32
    bf16 = jnp.bfloat16

    tq = q_ref.shape[2]              # q rows handled by this grid step
    T = k_ref.shape[2]               # full key/value length
    tp_pad = p_ref.shape[2]          # padded positional length
    wp = tp_pad - (T - tq)           # padded window width (multiple of 128)

    q = q_ref[0, 0].astype(f32)      # (tq, Dh), already scaled by 1/sqrt(Dh)
    k = k_ref[0, 0]                  # (T, Dh) bf16
    v = v_ref[0, 0]                  # (T, Dh) bf16
    u = u_ref[0]                     # (1, Dh) f32, pre-scaled
    vb = vb_ref[0]                   # (1, Dh) f32, pre-scaled

    qc = (q + u).astype(bf16)
    qp = (q + vb).astype(bf16)

    nt = (((1,), (1,)), ((), ()))    # A @ B.T: contract the last dims of both

    content = lax.dot_general(qc, k, nt, preferred_element_type=f32)      # (tq, T)

    # Positional window for this q block: rows [s0, s0 + wp) of the padded,
    # head-major projected positional embedding (s0 is a multiple of tq).
    qb = pl.program_id(2)
    s0 = T - tq - qb * tq
    if tq % 128 == 0:
        s0 = pl.multiple_of(s0, 128)
    elif tq % 8 == 0:
        s0 = pl.multiple_of(s0, 8)
    pe_w = p_ref[0, 0, pl.ds(s0, wp), :]                                  # (wp, Dh)
    pos_raw = lax.dot_general(qp, pe_w, nt, preferred_element_type=f32)   # (tq, wp)

    # Transformer-XL relative shift, fully vectorized:
    #     pos[r, j] = pos_raw[r, j + tq - 1 - r],   j in [0, T)
    # Row r is rotated right by r via log2(tq) uniform lane rolls gated
    # per-row; values wrapping through the zero-padded tail are never read by
    # the final slice.  (No per-row slicing, no tq-way concatenate.)
    # TODO(synk): a single strided pltpu.roll(..., stride=1, stride_axis=0)
    # would do this in one XLU op where supported.
    row = lax.broadcasted_iota(jnp.int32, (tq, wp), 0)
    x = pos_raw
    s = 1
    while s < tq:
        x = jnp.where((row & s) != 0, jnp.roll(x, s, axis=1), x)
        s *= 2
    pos = x[:, tq - 1:tq - 1 + T]                                         # (tq, T)

    score = content + pos            # 1/sqrt(Dh) already folded into q, u, vb
    score = score - jnp.max(score, axis=-1, keepdims=True)
    e = jnp.exp(score)
    attn = e * pl.reciprocal(jnp.sum(e, axis=-1, keepdims=True), approx=True)
    # TODO(synk): nn.Dropout(p=0.1) and the optional `mask` argument are the
    # identity here (inference path, mask=None).
    ctx = jnp.dot(attn.astype(bf16), v, preferred_element_type=f32)       # (tq, Dh)
    o_ref[0, 0] = ctx.astype(o_ref.dtype)


def _attention(qh, kh, vh, ph, u_s, v_s, tq):
    B, H, T, Dh = qh.shape
    tp_pad = ph.shape[2]
    n_qb = T // tq
    return pl.pallas_call(
        _attention_kernel,
        out_shape=jax.ShapeDtypeStruct((B, H, T, Dh), jnp.bfloat16),
        grid=(B, H, n_qb),
        in_specs=[
            pl.BlockSpec((1, 1, tq, Dh), lambda b, h, qb: (b, h, qb, 0)),
            pl.BlockSpec((1, 1, T, Dh), lambda b, h, qb: (b, h, 0, 0)),
            pl.BlockSpec((1, 1, T, Dh), lambda b, h, qb: (b, h, 0, 0)),
            pl.BlockSpec((1, 1, tp_pad, Dh), lambda b, h, qb: (b, h, 0, 0)),
            pl.BlockSpec((1, 1, Dh), lambda b, h, qb: (h, 0, 0)),
            pl.BlockSpec((1, 1, Dh), lambda b, h, qb: (h, 0, 0)),
        ],
        out_specs=pl.BlockSpec((1, 1, tq, Dh), lambda b, h, qb: (b, h, qb, 0)),
        compiler_params=pltpu.CompilerParams(
            dimension_semantics=("parallel", "parallel", "parallel")),
    )(qh, kh, vh, ph, u_s, v_s)


# --------------------------------- full forward -----------------------------------
def _pick_q_block(T):
    for c in range(min(T, 256), 7, -1):
        if T % c == 0 and c % 8 == 0:
            return c
    return T


def rmha_forward(q, k, v, pe, params, *, tq=None):
    """q/k/v: (B, T, D) f32; pe: (B, 2T-1, D) f32.  Linear weights are
    (in_features, out_features), i.e. y = x @ w + b."""
    B, T, D = q.shape
    Tp = pe.shape[1]
    H, Dh = params["u_bias"].shape
    assert D == H * Dh, "d_model must equal num_heads * d_head"
    assert Tp == 2 * T - 1, "pos_embedding length must be 2*seq-1"

    if tq is None:
        tq = _pick_q_block(T)
    assert T % tq == 0

    bf16 = jnp.bfloat16
    f32 = jnp.float32
    scale = 1.0 / math.sqrt(Dh)

    # ---- stage 1: input projections (computed once; lane-dense full-D GEMMs).
    wq = (params["wq"] * scale).astype(bf16)
    bq = (params["bq"] * scale).astype(f32)
    wk = params["wk"].astype(bf16)
    bk = params["bk"].astype(f32)
    wv = params["wv"].astype(bf16)
    bv = params["bv"].astype(f32)
    wp_ = params["wp"].astype(bf16)
    wo = params["wo"].astype(bf16)
    bo = params["bo"].astype(f32)
    zero_b = jnp.zeros((1, D), f32)

    q2 = _linear(q.reshape(B * T, D).astype(bf16), wq, bq, bf16)
    k2 = _linear(k.reshape(B * T, D).astype(bf16), wk, bk, bf16)
    v2 = _linear(v.reshape(B * T, D).astype(bf16), wv, bv, bf16)
    p2 = _linear(pe.reshape(B * Tp, D).astype(bf16), wp_, zero_b, bf16)

    # ---- head-major relayout (XLA): no in-kernel sub-128-lane head slicing.
    def head_major(x2d, rows):
        return x2d.reshape(B, rows, H, Dh).transpose(0, 2, 1, 3)

    qh = head_major(q2, T)
    kh = head_major(k2, T)
    vh = head_major(v2, T)
    ph = head_major(p2, Tp)

    # Pad the positional axis so each q-block window is a multiple of 128
    # lanes wide (padded rows are never selected after the relative shift).
    W = T + tq - 1
    Wp = ((W + 127) // 128) * 128
    tp_pad = (T - tq) + Wp
    ph = jnp.pad(ph, ((0, 0), (0, 0), (0, tp_pad - Tp), (0, 0)))

    u_s = (params["u_bias"] * scale).reshape(H, 1, Dh).astype(f32)
    v_s = (params["v_bias"] * scale).reshape(H, 1, Dh).astype(f32)

    # ---- stage 2: attention core.
    # TODO(synk): for very long T switch to flash-style online-softmax KV
    # tiling instead of keeping full-T scores per q block.
    ctx = _attention(qh, kh, vh, ph, u_s, v_s, tq)          # (B, H, T, Dh) bf16

    # ---- stage 3: output projection as one lane-dense (B*T, D) x (D, D) GEMM.
    ctx2d = ctx.transpose(0, 2, 1, 3).reshape(B * T, D)
    out = _linear(ctx2d, wo, bo, q.dtype)
    return out.reshape(B, T, D)


# ----------------------- pure-JAX reference (mirrors torch) -----------------------
def rmha_reference(q, k, v, pe, params):
    B, T, D = q.shape
    H, Dh = params["u_bias"].shape
    hp = lax.Precision.HIGHEST

    def lin(x, w, b=None):
        y = jnp.einsum("btd,de->bte", x, w, precision=hp)
        return y if b is None else y + b

    Q = lin(q, params["wq"], params["bq"]).reshape(B, -1, H, Dh)
    K = lin(k, params["wk"], params["bk"]).reshape(B, -1, H, Dh).transpose(0, 2, 1, 3)
    V = lin(v, params["wv"], params["bv"]).reshape(B, -1, H, Dh).transpose(0, 2, 1, 3)
    P = lin(pe, params["wp"]).reshape(B, -1, H, Dh)

    content = jnp.einsum("bthd,bhsd->bhts", Q + params["u_bias"], K, precision=hp)
    pos = jnp.einsum("bthd,bshd->bhts", Q + params["v_bias"], P, precision=hp)

    # torch _relative_shift, verbatim semantics
    b_, h_, s1, s2 = pos.shape
    zeros = jnp.zeros((b_, h_, s1, 1), pos.dtype)
    padded = jnp.concatenate([zeros, pos], axis=-1).reshape(b_, h_, s2 + 1, s1)
    pos = padded[:, :, 1:].reshape(b_, h_, s1, s2)[:, :, :, : s2 // 2 + 1]

    score = (content + pos) / math.sqrt(Dh)
    attn = jax.nn.softmax(score, axis=-1)
    ctx = jnp.einsum("bhts,bhsd->bthd", attn, V, precision=hp).reshape(B, T, D)
    return lin(ctx, params["wo"], params["bo"])


def init_params(key, d_model, num_heads):
    dh = d_model // num_heads
    ks = jax.random.split(key, 11)
    s = 1.0 / math.sqrt(d_model)
    xav = math.sqrt(6.0 / (num_heads + dh))   # xavier_uniform bound for (H, Dh)

    def w(kk):
        return jax.random.normal(kk, (d_model, d_model), jnp.float32) * s

    def b(kk):
        return jax.random.normal(kk, (1, d_model), jnp.float32) * 0.02

    return {
        "wq": w(ks[0]), "bq": b(ks[1]),
        "wk": w(ks[2]), "bk": b(ks[3]),
        "wv": w(ks[4]), "bv": b(ks[5]),
        "wp": w(ks[6]),
        "wo": w(ks[7]), "bo": b(ks[8]),
        "u_bias": jax.random.uniform(ks[9], (num_heads, dh), jnp.float32, -xav, xav),
        "v_bias": jax.random.uniform(ks[10], (num_heads, dh), jnp.float32, -xav, xav),
    }


if __name__ == "__main__":
    B, T, D, H = 2, 8, 32, 4
    Tp = 2 * T - 1

    root = jax.random.PRNGKey(0)
    kq, kk, kv, kp, kparam = jax.random.split(root, 5)
    q = jax.random.normal(kq, (B, T, D), jnp.float32)
    k = jax.random.normal(kk, (B, T, D), jnp.float32)
    v = jax.random.normal(kv, (B, T, D), jnp.float32)
    pe = jax.random.normal(kp, (B, Tp, D), jnp.float32)
    params = init_params(kparam, D, H)

    fwd = jax.jit(rmha_forward)
    out = jax.block_until_ready(fwd(q, k, v, pe, params))

    ref = rmha_reference(q, k, v, pe, params)
    max_err = float(jnp.max(jnp.abs(out - ref)))
    ref_scale = float(jnp.max(jnp.abs(ref)))
    assert out.shape == (B, T, D)
    # bf16 MXU operands + approx softmax reciprocal -> looser tolerance than f32.
    assert max_err <= 5e-2 + 3e-2 * ref_scale, (
        f"mismatch vs reference: max abs err = {max_err}, ref scale = {ref_scale}")
    print("KERNEL_OK")
</pallas_src>

<mosaic_0001>
module attributes {stable_mosaic.version = 11 : i64} {
  func.func @_linear_kernel(%arg0: i32, %arg1: i32, %arg2: memref<16x32xbf16, #tpu.memory_space<vmem>>, %arg3: memref<32x32xbf16, #tpu.memory_space<vmem>>, %arg4: memref<1x32xf32, #tpu.memory_space<vmem>>, %arg5: memref<16x32xbf16, #tpu.memory_space<vmem>>, %arg6: memref<16x32xf32, #tpu.memory_space<vmem>>) attributes {dimension_semantics = [#tpu.dimension_semantics<parallel>, #tpu.dimension_semantics<arbitrary>], iteration_bounds = array<i64: 1, 1>, scalar_prefetch = 0 : i64, scratch_operands = 1 : i64, tpu.core_type = #tpu.core_type<tc>, window_params = [{transform_indices = @transform_0, window_bounds = array<i64: 16, 32>}, {transform_indices = @transform_1, window_bounds = array<i64: 32, 32>}, {pipeline_mode = #tpu.pipeline_mode<synchronous>, transform_indices = @transform_2, window_bounds = array<i64: 1, 32>}, {transform_indices = @transform_3, window_bounds = array<i64: 16, 32>}]} {
    %c0_i32 = arith.constant 0 : i32
    %0 = arith.cmpi eq, %arg1, %c0_i32 : i32
    %1 = arith.extui %0 : i1 to i32
    %c0_i32_0 = arith.constant 0 : i32
    %2 = arith.cmpi ne, %1, %c0_i32_0 : i32
    scf.if %2 {
      %cst_10 = arith.constant 0.000000e+00 : f32
      %12 = vector.broadcast %cst_10 : f32 to vector<16x32xf32>
      %c0_11 = arith.constant 0 : index
      %c0_12 = arith.constant 0 : index
      %13 = vector.load %arg6[%c0_11, %c0_12] : memref<16x32xf32, #tpu.memory_space<vmem>>, vector<16x32xf32>
      tpu.vector_store %arg6[%c0_11, %c0_12], %12 {strides = array<i32>} : memref<16x32xf32, #tpu.memory_space<vmem>>, vector<16x32xf32>,
    } else {
    }
    %c0 = arith.constant 0 : index
    %c0_1 = arith.constant 0 : index
    %3 = vector.load %arg6[%c0, %c0_1] : memref<16x32xf32, #tpu.memory_space<vmem>>, vector<16x32xf32>
    %c0_2 = arith.constant 0 : index
    %c0_3 = arith.constant 0 : index
    %4 = vector.load %arg2[%c0_2, %c0_3] : memref<16x32xbf16, #tpu.memory_space<vmem>>, vector<16x32xbf16>
    %c0_4 = arith.constant 0 : index
    %c0_5 = arith.constant 0 : index
    %5 = vector.load %arg3[%c0_4, %c0_5] : memref<32x32xbf16, #tpu.memory_space<vmem>>, vector<32x32xbf16>
    %cst = arith.constant dense<0.000000e+00> : vector<16x32xf32>
    %6 = tpu.matmul %4, %5, %cst {dimension_numbers = #tpu.dot_dimension_numbers<[1], [0], [0], [1], [0, 0, 1, 1], [], []>} : vector<16x32xbf16>, vector<32x32xbf16>, vector<16x32xf32> -> vector<16x32xf32>
    %7 = arith.addf %3, %6 : vector<16x32xf32>
    %c0_6 = arith.constant 0 : index
    %c0_7 = arith.constant 0 : index
    %8 = vector.load %arg6[%c0_6, %c0_7] : memref<16x32xf32, #tpu.memory_space<vmem>>, vector<16x32xf32>
    tpu.vector_store %arg6[%c0_6, %c0_7], %7 {strides = array<i32>} : memref<16x32xf32, #tpu.memory_space<vmem>>, vector<16x32xf32>,
    %c0_i32_8 = arith.constant 0 : i32
    %9 = arith.cmpi eq, %arg1, %c0_i32_8 : i32
    %10 = arith.extui %9 : i1 to i32
    %c0_i32_9 = arith.constant 0 : i32
    %11 = arith.cmpi ne, %10, %c0_i32_9 : i32
    scf.if %11 {
      %c0_10 = arith.constant 0 : index
      %c0_11 = arith.constant 0 : index
      %12 = vector.load %arg6[%c0_10, %c0_11] : memref<16x32xf32, #tpu.memory_space<vmem>>, vector<16x32xf32>
      %c0_12 = arith.constant 0 : index
      %c0_13 = arith.constant 0 : index
      %13 = vector.load %arg4[%c0_12, %c0_13] : memref<1x32xf32, #tpu.memory_space<vmem>>, vector<1x32xf32>
      %14 = vector.broadcast %13 : vector<1x32xf32> to vector<16x32xf32>
      %15 = arith.addf %12, %14 : vector<16x32xf32>
      %16 = arith.truncf %15 : vector<16x32xf32> to vector<16x32xbf16>
      %c0_14 = arith.constant 0 : index
      %c0_15 = arith.constant 0 : index
      %17 = vector.load %arg5[%c0_14, %c0_15] : memref<16x32xbf16, #tpu.memory_space<vmem>>, vector<16x32xbf16>
      tpu.vector_store %arg5[%c0_14, %c0_15], %16 {strides = array<i32>} : memref<16x32xbf16, #tpu.memory_space<vmem>>, vector<16x32xbf16>,
    } else {
    }
    return
  }
  func.func @transform_0(%arg0: i32, %arg1: i32) -> (i32, i32) {
    %c0_i32 = arith.constant 0 : i32
    return %arg0, %arg1 : i32, i32
  }
  func.func @transform_1(%arg0: i32, %arg1: i32) -> (i32, i32) {
    %c0_i32 = arith.constant 0 : i32
    %c0_i32_0 = arith.constant 0 : i32
    return %arg1, %c0_i32 : i32, i32
  }
  func.func @transform_2(%arg0: i32, %arg1: i32) -> (i32, i32) {
    %c0_i32 = arith.constant 0 : i32
    %c0_i32_0 = arith.constant 0 : i32
    %c0_i32_1 = arith.constant 0 : i32
    return %c0_i32, %c0_i32_0 : i32, i32
  }
  func.func @transform_3(%arg0: i32, %arg1: i32) -> (i32, i32) {
    %c0_i32 = arith.constant 0 : i32
    %c0_i32_0 = arith.constant 0 : i32
    return %arg0, %c0_i32 : i32, i32
  }
}

module attributes {stable_mosaic.version = 11 : i64} {
  func.func @_linear_kernel(%arg0: i32, %arg1: i32, %arg2: memref<30x32xbf16, #tpu.memory_space<vmem>>, %arg3: memref<32x32xbf16, #tpu.memory_space<vmem>>, %arg4: memref<1x32xf32, #tpu.memory_space<vmem>>, %arg5: memref<30x32xbf16, #tpu.memory_space<vmem>>, %arg6: memref<30x32xf32, #tpu.memory_space<vmem>>) attributes {dimension_semantics = [#tpu.dimension_semantics<parallel>, #tpu.dimension_semantics<arbitrary>], iteration_bounds = array<i64: 1, 1>, scalar_prefetch = 0 : i64, scratch_operands = 1 : i64, tpu.core_type = #tpu.core_type<tc>, window_params = [{transform_indices = @transform_0, window_bounds = array<i64: 30, 32>}, {transform_indices = @transform_1, window_bounds = array<i64: 32, 32>}, {pipeline_mode = #tpu.pipeline_mode<synchronous>, transform_indices = @transform_2, window_bounds = array<i64: 1, 32>}, {transform_indices = @transform_3, window_bounds = array<i64: 30, 32>}]} {
    %c0_i32 = arith.constant 0 : i32
    %0 = arith.cmpi eq, %arg1, %c0_i32 : i32
    %1 = arith.extui %0 : i1 to i32
    %c0_i32_0 = arith.constant 0 : i32
    %2 = arith.cmpi ne, %1, %c0_i32_0 : i32
    scf.if %2 {
      %cst_10 = arith.constant 0.000000e+00 : f32
      %12 = vector.broadcast %cst_10 : f32 to vector<30x32xf32>
      %c0_11 = arith.constant 0 : index
      %c0_12 = arith.constant 0 : index
      %13 = vector.load %arg6[%c0_11, %c0_12] : memref<30x32xf32, #tpu.memory_space<vmem>>, vector<30x32xf32>
      tpu.vector_store %arg6[%c0_11, %c0_12], %12 {strides = array<i32>} : memref<30x32xf32, #tpu.memory_space<vmem>>, vector<30x32xf32>,
    } else {
    }
    %c0 = arith.constant 0 : index
    %c0_1 = arith.constant 0 : index
    %3 = vector.load %arg6[%c0, %c0_1] : memref<30x32xf32, #tpu.memory_space<vmem>>, vector<30x32xf32>
    %c0_2 = arith.constant 0 : index
    %c0_3 = arith.constant 0 : index
    %4 = vector.load %arg2[%c0_2, %c0_3] : memref<30x32xbf16, #tpu.memory_space<vmem>>, vector<30x32xbf16>
    %c0_4 = arith.constant 0 : index
    %c0_5 = arith.constant 0 : index
    %5 = vector.load %arg3[%c0_4, %c0_5] : memref<32x32xbf16, #tpu.memory_space<vmem>>, vector<32x32xbf16>
    %cst = arith.constant dense<0.000000e+00> : vector<30x32xf32>
    %6 = tpu.matmul %4, %5, %cst {dimension_numbers = #tpu.dot_dimension_numbers<[1], [0], [0], [1], [0, 0, 1, 1], [], []>} : vector<30x32xbf16>, vector<32x32xbf16>, vector<30x32xf32> -> vector<30x32xf32>
    %7 = arith.addf %3, %6 : vector<30x32xf32>
    %c0_6 = arith.constant 0 : index
    %c0_7 = arith.constant 0 : index
    %8 = vector.load %arg6[%c0_6, %c0_7] : memref<30x32xf32, #tpu.memory_space<vmem>>, vector<30x32xf32>
    tpu.vector_store %arg6[%c0_6, %c0_7], %7 {strides = array<i32>} : memref<30x32xf32, #tpu.memory_space<vmem>>, vector<30x32xf32>,
    %c0_i32_8 = arith.constant 0 : i32
    %9 = arith.cmpi eq, %arg1, %c0_i32_8 : i32
    %10 = arith.extui %9 : i1 to i32
    %c0_i32_9 = arith.constant 0 : i32
    %11 = arith.cmpi ne, %10, %c0_i32_9 : i32
    scf.if %11 {
      %c0_10 = arith.constant 0 : index
      %c0_11 = arith.constant 0 : index
      %12 = vector.load %arg6[%c0_10, %c0_11] : memref<30x32xf32, #tpu.memory_space<vmem>>, vector<30x32xf32>
      %c0_12 = arith.constant 0 : index
      %c0_13 = arith.constant 0 : index
      %13 = vector.load %arg4[%c0_12, %c0_13] : memref<1x32xf32, #tpu.memory_space<vmem>>, vector<1x32xf32>
      %14 = vector.broadcast %13 : vector<1x32xf32> to vector<30x32xf32>
      %15 = arith.addf %12, %14 : vector<30x32xf32>
      %16 = arith.truncf %15 : vector<30x32xf32> to vector<30x32xbf16>
      %c0_14 = arith.constant 0 : index
      %c0_15 = arith.constant 0 : index
      %17 = vector.load %arg5[%c0_14, %c0_15] : memref<30x32xbf16, #tpu.memory_space<vmem>>, vector<30x32xbf16>
      tpu.vector_store %arg5[%c0_14, %c0_15], %16 {strides = array<i32>} : memref<30x32xbf16, #tpu.memory_space<vmem>>, vector<30x32xbf16>,
    } else {
    }
    return
  }
  func.func @transform_0(%arg0: i32, %arg1: i32) -> (i32, i32) {
    %c0_i32 = arith.constant 0 : i32
    return %arg0, %arg1 : i32, i32
  }
  func.func @transform_1(%arg0: i32, %arg1: i32) -> (i32, i32) {
    %c0_i32 = arith.constant 0 : i32
    %c0_i32_0 = arith.constant 0 : i32
    return %arg1, %c0_i32 : i32, i32
  }
  func.func @transform_2(%arg0: i32, %arg1: i32) -> (i32, i32) {
    %c0_i32 = arith.constant 0 : i32
    %c0_i32_0 = arith.constant 0 : i32
    %c0_i32_1 = arith.constant 0 : i32
    return %c0_i32, %c0_i32_0 : i32, i32
  }
  func.func @transform_3(%arg0: i32, %arg1: i32) -> (i32, i32) {
    %c0_i32 = arith.constant 0 : i32
    %c0_i32_0 = arith.constant 0 : i32
    return %arg0, %c0_i32 : i32, i32
  }
}

module attributes {stable_mosaic.version = 11 : i64} {
  func.func @_attention_kernel(%arg0: i32, %arg1: i32, %arg2: i32, %arg3: memref<1x1x8x8xbf16, #tpu.memory_space<vmem>>, %arg4: memref<1x1x8x8xbf16, #tpu.memory_space<vmem>>, %arg5: memref<1x1x8x8xbf16, #tpu.memory_space<vmem>>, %arg6: memref<1x1x128x8xbf16, #tpu.memory_space<vmem>>, %arg7: memref<1x1x8xf32, #tpu.memory_space<vmem>>, %arg8: memref<1x1x8xf32, #tpu.memory_space<vmem>>, %arg9: memref<1x1x8x8xbf16, #tpu.memory_space<vmem>>) attributes {dimension_semantics = [#tpu.dimension_semantics<parallel>, #tpu.dimension_semantics<parallel>, #tpu.dimension_semantics<parallel>], iteration_bounds = array<i64: 2, 4, 1>, scalar_prefetch = 0 : i64, scratch_operands = 0 : i64, tpu.core_type = #tpu.core_type<tc>, window_params = [{transform_indices = @transform_0, window_bounds = array<i64: 1, 1, 8, 8>}, {transform_indices = @transform_1, window_bounds = array<i64: 1, 1, 8, 8>}, {transform_indices = @transform_2, window_bounds = array<i64: 1, 1, 8, 8>}, {transform_indices = @transform_3, window_bounds = array<i64: 1, 1, 128, 8>}, {transform_indices = @transform_4, window_bounds = array<i64: 1, 1, 8>}, {transform_indices = @transform_5, window_bounds = array<i64: 1, 1, 8>}, {transform_indices = @transform_6, window_bounds = array<i64: 1, 1, 8, 8>}]} {
    %c0 = arith.constant 0 : index
    %c0_0 = arith.constant 0 : index
    %c0_1 = arith.constant 0 : index
    %c0_2 = arith.constant 0 : index
    %0 = vector.load %arg3[%c0, %c0_0, %c0_1, %c0_2] : memref<1x1x8x8xbf16, #tpu.memory_space<vmem>>, vector<1x1x8x8xbf16>
    %1 = vector.shape_cast %0 : vector<1x1x8x8xbf16> to vector<8x8xbf16>
    %2 = arith.extf %1 : vector<8x8xbf16> to vector<8x8xf32>
    %c0_3 = arith.constant 0 : index
    %c0_4 = arith.constant 0 : index
    %c0_5 = arith.constant 0 : index
    %c0_6 = arith.constant 0 : index
    %3 = vector.load %arg4[%c0_3, %c0_4, %c0_5, %c0_6] : memref<1x1x8x8xbf16, #tpu.memory_space<vmem>>, vector<1x1x8x8xbf16>
    %4 = vector.shape_cast %3 : vector<1x1x8x8xbf16> to vector<8x8xbf16>
    %c0_7 = arith.constant 0 : index
    %c0_8 = arith.constant 0 : index
    %c0_9 = arith.constant 0 : index
    %c0_10 = arith.constant 0 : index
    %5 = vector.load %arg5[%c0_7, %c0_8, %c0_9, %c0_10] : memref<1x1x8x8xbf16, #tpu.memory_space<vmem>>, vector<1x1x8x8xbf16>
    %6 = vector.shape_cast %5 : vector<1x1x8x8xbf16> to vector<8x8xbf16>
    %c0_11 = arith.constant 0 : index
    %c0_12 = arith.constant 0 : index
    %c0_13 = arith.constant 0 : index
    %7 = vector.load %arg7[%c0_11, %c0_12, %c0_13] : memref<1x1x8xf32, #tpu.memory_space<vmem>>, vector<1x1x8xf32>
    %8 = vector.shape_cast %7 : vector<1x1x8xf32> to vector<1x8xf32>
    %c0_14 = arith.constant 0 : index
    %c0_15 = arith.constant 0 : index
    %c0_16 = arith.constant 0 : index
    %9 = vector.load %arg8[%c0_14, %c0_15, %c0_16] : memref<1x1x8xf32, #tpu.memory_space<vmem>>, vector<1x1x8xf32>
    %10 = vector.shape_cast %9 : vector<1x1x8xf32> to vector<1x8xf32>
    %11 = vector.broadcast %8 : vector<1x8xf32> to vector<8x8xf32>
    %12 = arith.addf %2, %11 : vector<8x8xf32>
    %13 = arith.truncf %12 : vector<8x8xf32> to vector<8x8xbf16>
    %14 = vector.broadcast %10 : vector<1x8xf32> to vector<8x8xf32>
    %15 = arith.addf %2, %14 : vector<8x8xf32>
    %16 = arith.truncf %15 : vector<8x8xf32> to vector<8x8xbf16>
    %cst = arith.constant dense<0.000000e+00> : vector<8x8xf32>
    %17 = tpu.matmul %13, %4, %cst {dimension_numbers = #tpu.dot_dimension_numbers<[1], [1], [0], [0], [0, 0, 1, 0], [], []>} : vector<8x8xbf16>, vector<8x8xbf16>, vector<8x8xf32> -> vector<8x8xf32>
    %c8_i32 = arith.constant 8 : i32
    %18 = arith.muli %arg2, %c8_i32 : i32
    %c0_i32 = arith.constant 0 : i32
    %19 = arith.subi %c0_i32, %18 : i32
    %20 = tpu.assume_multiple %19, 8 : i32
    %c0_17 = arith.constant 0 : index
    %c0_18 = arith.constant 0 : index
    %21 = arith.index_cast %20 : i32 to index
    %c0_19 = arith.constant 0 : index
    %22 = vector.load %arg6[%c0_17, %c0_18, %21, %c0_19] : memref<1x1x128x8xbf16, #tpu.memory_space<vmem>>, vector<1x1x128x8xbf16>
    %23 = vector.shape_cast %22 : vector<1x1x128x8xbf16> to vector<128x8xbf16>
    %cst_20 = arith.constant dense<0.000000e+00> : vector<8x128xf32>
    %24 = tpu.matmul %16, %23, %cst_20 {dimension_numbers = #tpu.dot_dimension_numbers<[1], [1], [0], [0], [0, 0, 1, 0], [], []>} : vector<8x8xbf16>, vector<128x8xbf16>, vector<8x128xf32> -> vector<8x128xf32>
    %25 = tpu.iota {dimensions = array<i32: 0>} : vector<8x128xi32>
    %c1_i32 = arith.constant 1 : i32
    %26 = vector.broadcast %c1_i32 : i32 to vector<8x128xi32>
    %27 = arith.andi %25, %26 : vector<8x128xi32>
    %c0_i32_21 = arith.constant 0 : i32
    %28 = vector.broadcast %c0_i32_21 : i32 to vector<8x128xi32>
    %29 = arith.cmpi ne, %27, %28 : vector<8x128xi32>
    %30 = vector.extract_strided_slice %24 {offsets = [0, 127], sizes = [8, 1], strides = [1, 1]} : vector<8x128xf32> to vector<8x1xf32>
    %31 = vector.extract_strided_slice %24 {offsets = [0, 0], sizes = [8, 127], strides = [1, 1]} : vector<8x128xf32> to vector<8x127xf32>
    %32 = tpu.concatenate %30, %31 in 1 : vector<8x1xf32>, vector<8x127xf32> -> vector<8x128xf32>
    %33 = arith.select %29, %32, %24 : vector<8x128xi1>, vector<8x128xf32>
    %c2_i32 = arith.constant 2 : i32
    %34 = vector.broadcast %c2_i32 : i32 to vector<8x128xi32>
    %35 = arith.andi %25, %34 : vector<8x128xi32>
    %c0_i32_22 = arith.constant 0 : i32
    %36 = vector.broadcast %c0_i32_22 : i32 to vector<8x128xi32>
    %37 = arith.cmpi ne, %35, %36 : vector<8x128xi32>
    %38 = vector.extract_strided_slice %33 {offsets = [0, 126], sizes = [8, 2], strides = [1, 1]} : vector<8x128xf32> to vector<8x2xf32>
    %39 = vector.extract_strided_slice %33 {offsets = [0, 0], sizes = [8, 126], strides = [1, 1]} : vector<8x128xf32> to vector<8x126xf32>
    %40 = tpu.concatenate %38, %39 in 1 : vector<8x2xf32>, vector<8x126xf32> -> vector<8x128xf32>
    %41 = arith.select %37, %40, %33 : vector<8x128xi1>, vector<8x128xf32>
    %c4_i32 = arith.constant 4 : i32
    %42 = vector.broadcast %c4_i32 : i32 to vector<8x128xi32>
    %43 = arith.andi %25, %42 : vector<8x128xi32>
    %c0_i32_23 = arith.constant 0 : i32
    %44 = vector.broadcast %c0_i32_23 : i32 to vector<8x128xi32>
    %45 = arith.cmpi ne, %43, %44 : vector<8x128xi32>
    %46 = vector.extract_strided_slice %41 {offsets = [0, 124], sizes = [8, 4], strides = [1, 1]} : vector<8x128xf32> to vector<8x4xf32>
    %47 = vector.extract_strided_slice %41 {offsets = [0, 0], sizes = [8, 124], strides = [1, 1]} : vector<8x128xf32> to vector<8x124xf32>
    %48 = tpu.concatenate %46, %47 in 1 : vector<8x4xf32>, vector<8x124xf32> -> vector<8x128xf32>
    %49 = arith.select %45, %48, %41 : vector<8x128xi1>, vector<8x128xf32>
    %50 = vector.extract_strided_slice %49 {offsets = [0, 7], sizes = [8, 8], strides = [1, 1]} : vector<8x128xf32> to vector<8x8xf32>
    %51 = arith.addf %17, %50 : vector<8x8xf32>
    %cst_24 = arith.constant dense<0xFF800000> : vector<8xf32>
    %52 = vector.multi_reduction <maximumf>, %51, %cst_24 [1] : vector<8x8xf32> to vector<8xf32>
    %53 = vector.shape_cast %52 : vector<8xf32> to vector<8x1xf32>
    %54 = vector.broadcast %53 : vector<8x1xf32> to vector<8x8xf32>
    %55 = arith.subf %51, %54 : vector<8x8xf32>
    %56 = math.exp %55 : vector<8x8xf32>
    %cst_25 = arith.constant dense<0.000000e+00> : vector<8xf32>
    %57 = vector.multi_reduction <add>, %56, %cst_25 [1] : vector<8x8xf32> to vector<8xf32>
    %58 = vector.shape_cast %57 : vector<8xf32> to vector<8x1xf32>
    %59 = tpu.reciprocal %58 {approx = true} : vector<8x1xf32> -> vector<8x1xf32>
    %60 = vector.broadcast %59 : vector<8x1xf32> to vector<8x8xf32>
    %61 = arith.mulf %56, %60 : vector<8x8xf32>
    %62 = arith.truncf %61 : vector<8x8xf32> to vector<8x8xbf16>
    %cst_26 = arith.constant dense<0.000000e+00> : vector<8x8xf32>
    %63 = tpu.matmul %62, %6, %cst_26 {dimension_numbers = #tpu.dot_dimension_numbers<[1], [0], [0], [1], [0, 0, 1, 1], [], []>} : vector<8x8xbf16>, vector<8x8xbf16>, vector<8x8xf32> -> vector<8x8xf32>
    %64 = arith.truncf %63 : vector<8x8xf32> to vector<8x8xbf16>
    %c0_27 = arith.constant 0 : index
    %c0_28 = arith.constant 0 : index
    %c0_29 = arith.constant 0 : index
    %c0_30 = arith.constant 0 : index
    %65 = vector.load %arg9[%c0_27, %c0_28, %c0_29, %c0_30] : memref<1x1x8x8xbf16, #tpu.memory_space<vmem>>, vector<1x1x8x8xbf16>
    %66 = vector.shape_cast %65 : vector<1x1x8x8xbf16> to vector<8x8xbf16>
    %67 = vector.shape_cast %64 : vector<8x8xbf16> to vector<1x1x8x8xbf16>
    tpu.vector_store %arg9[%c0_27, %c0_28, %c0_29, %c0_30], %67 {strides = array<i32>} : memref<1x1x8x8xbf16, #tpu.memory_space<vmem>>, vector<1x1x8x8xbf16>,
    return
  }
  func.func @transform_0(%arg0: i32, %arg1: i32, %arg2: i32) -> (i32, i32, i32, i32) {
    %c0_i32 = arith.constant 0 : i32
    %c0_i32_0 = arith.constant 0 : i32
    return %arg0, %arg1, %arg2, %c0_i32 : i32, i32, i32, i32
  }
  func.func @transform_1(%arg0: i32, %arg1: i32, %arg2: i32) -> (i32, i32, i32, i32) {
    %c0_i32 = arith.constant 0 : i32
    %c0_i32_0 = arith.constant 0 : i32
    %c0_i32_1 = arith.constant 0 : i32
    return %arg0, %arg1, %c0_i32, %c0_i32_0 : i32, i32, i32, i32
  }
  func.func @transform_2(%arg0: i32, %arg1: i32, %arg2: i32) -> (i32, i32, i32, i32) {
    %c0_i32 = arith.constant 0 : i32
    %c0_i32_0 = arith.constant 0 : i32
    %c0_i32_1 = arith.constant 0 : i32
    return %arg0, %arg1, %c0_i32, %c0_i32_0 : i32, i32, i32, i32
  }
  func.func @transform_3(%arg0: i32, %arg1: i32, %arg2: i32) -> (i32, i32, i32, i32) {
    %c0_i32 = arith.constant 0 : i32
    %c0_i32_0 = arith.constant 0 : i32
    %c0_i32_1 = arith.constant 0 : i32
    return %arg0, %arg1, %c0_i32, %c0_i32_0 : i32, i32, i32, i32
  }
  func.func @transform_4(%arg0: i32, %arg1: i32, %arg2: i32) -> (i32, i32, i32) {
    %c0_i32 = arith.constant 0 : i32
    %c0_i32_0 = arith.constant 0 : i32
    %c0_i32_1 = arith.constant 0 : i32
    return %arg1, %c0_i32, %c0_i32_0 : i32, i32, i32
  }
  func.func @transform_5(%arg0: i32, %arg1: i32, %arg2: i32) -> (i32, i32, i32) {
    %c0_i32 = arith.constant 0 : i32
    %c0_i32_0 = arith.constant 0 : i32
    %c0_i32_1 = arith.constant 0 : i32
    return %arg1, %c0_i32, %c0_i32_0 : i32, i32, i32
  }
  func.func @transform_6(%arg0: i32, %arg1: i32, %arg2: i32) -> (i32, i32, i32, i32) {
    %c0_i32 = arith.constant 0 : i32
    %c0_i32_0 = arith.constant 0 : i32
    return %arg0, %arg1, %arg2, %c0_i32 : i32, i32, i32, i32
  }
}

module attributes {stable_mosaic.version = 11 : i64} {
  func.func @_linear_kernel(%arg0: i32, %arg1: i32, %arg2: memref<16x32xbf16, #tpu.memory_space<vmem>>, %arg3: memref<32x32xbf16, #tpu.memory_space<vmem>>, %arg4: memref<1x32xf32, #tpu.memory_space<vmem>>, %arg5: memref<16x32xf32, #tpu.memory_space<vmem>>, %arg6: memref<16x32xf32, #tpu.memory_space<vmem>>) attributes {dimension_semantics = [#tpu.dimension_semantics<parallel>, #tpu.dimension_semantics<arbitrary>], iteration_bounds = array<i64: 1, 1>, scalar_prefetch = 0 : i64, scratch_operands = 1 : i64, tpu.core_type = #tpu.core_type<tc>, window_params = [{transform_indices = @transform_0, window_bounds = array<i64: 16, 32>}, {transform_indices = @transform_1, window_bounds = array<i64: 32, 32>}, {pipeline_mode = #tpu.pipeline_mode<synchronous>, transform_indices = @transform_2, window_bounds = array<i64: 1, 32>}, {transform_indices = @transform_3, window_bounds = array<i64: 16, 32>}]} {
    %c0_i32 = arith.constant 0 : i32
    %0 = arith.cmpi eq, %arg1, %c0_i32 : i32
    %1 = arith.extui %0 : i1 to i32
    %c0_i32_0 = arith.constant 0 : i32
    %2 = arith.cmpi ne, %1, %c0_i32_0 : i32
    scf.if %2 {
      %cst_10 = arith.constant 0.000000e+00 : f32
      %12 = vector.broadcast %cst_10 : f32 to vector<16x32xf32>
      %c0_11 = arith.constant 0 : index
      %c0_12 = arith.constant 0 : index
      %13 = vector.load %arg6[%c0_11, %c0_12] : memref<16x32xf32, #tpu.memory_space<vmem>>, vector<16x32xf32>
      tpu.vector_store %arg6[%c0_11, %c0_12], %12 {strides = array<i32>} : memref<16x32xf32, #tpu.memory_space<vmem>>, vector<16x32xf32>,
    } else {
    }
    %c0 = arith.constant 0 : index
    %c0_1 = arith.constant 0 : index
    %3 = vector.load %arg6[%c0, %c0_1] : memref<16x32xf32, #tpu.memory_space<vmem>>, vector<16x32xf32>
    %c0_2 = arith.constant 0 : index
    %c0_3 = arith.constant 0 : index
    %4 = vector.load %arg2[%c0_2, %c0_3] : memref<16x32xbf16, #tpu.memory_space<vmem>>, vector<16x32xbf16>
    %c0_4 = arith.constant 0 : index
    %c0_5 = arith.constant 0 : index
    %5 = vector.load %arg3[%c0_4, %c0_5] : memref<32x32xbf16, #tpu.memory_space<vmem>>, vector<32x32xbf16>
    %cst = arith.constant dense<0.000000e+00> : vector<16x32xf32>
    %6 = tpu.matmul %4, %5, %cst {dimension_numbers = #tpu.dot_dimension_numbers<[1], [0], [0], [1], [0, 0, 1, 1], [], []>} : vector<16x32xbf16>, vector<32x32xbf16>, vector<16x32xf32> -> vector<16x32xf32>
    %7 = arith.addf %3, %6 : vector<16x32xf32>
    %c0_6 = arith.constant 0 : index
    %c0_7 = arith.constant 0 : index
    %8 = vector.load %arg6[%c0_6, %c0_7] : memref<16x32xf32, #tpu.memory_space<vmem>>, vector<16x32xf32>
    tpu.vector_store %arg6[%c0_6, %c0_7], %7 {strides = array<i32>} : memref<16x32xf32, #tpu.memory_space<vmem>>, vector<16x32xf32>,
    %c0_i32_8 = arith.constant 0 : i32
    %9 = arith.cmpi eq, %arg1, %c0_i32_8 : i32
    %10 = arith.extui %9 : i1 to i32
    %c0_i32_9 = arith.constant 0 : i32
    %11 = arith.cmpi ne, %10, %c0_i32_9 : i32
    scf.if %11 {
      %c0_10 = arith.constant 0 : index
      %c0_11 = arith.constant 0 : index
      %12 = vector.load %arg6[%c0_10, %c0_11] : memref<16x32xf32, #tpu.memory_space<vmem>>, vector<16x32xf32>
      %c0_12 = arith.constant 0 : index
      %c0_13 = arith.constant 0 : index
      %13 = vector.load %arg4[%c0_12, %c0_13] : memref<1x32xf32, #tpu.memory_space<vmem>>, vector<1x32xf32>
      %14 = vector.broadcast %13 : vector<1x32xf32> to vector<16x32xf32>
      %15 = arith.addf %12, %14 : vector<16x32xf32>
      %c0_14 = arith.constant 0 : index
      %c0_15 = arith.constant 0 : index
      %16 = vector.load %arg5[%c0_14, %c0_15] : memref<16x32xf32, #tpu.memory_space<vmem>>, vector<16x32xf32>
      tpu.vector_store %arg5[%c0_14, %c0_15], %15 {strides = array<i32>} : memref<16x32xf32, #tpu.memory_space<vmem>>, vector<16x32xf32>,
    } else {
    }
    return
  }
  func.func @transform_0(%arg0: i32, %arg1: i32) -> (i32, i32) {
    %c0_i32 = arith.constant 0 : i32
    return %arg0, %arg1 : i32, i32
  }
  func.func @transform_1(%arg0: i32, %arg1: i32) -> (i32, i32) {
    %c0_i32 = arith.constant 0 : i32
    %c0_i32_0 = arith.constant 0 : i32
    return %arg1, %c0_i32 : i32, i32
  }
  func.func @transform_2(%arg0: i32, %arg1: i32) -> (i32, i32) {
    %c0_i32 = arith.constant 0 : i32
    %c0_i32_0 = arith.constant 0 : i32
    %c0_i32_1 = arith.constant 0 : i32
    return %c0_i32, %c0_i32_0 : i32, i32
  }
  func.func @transform_3(%arg0: i32, %arg1: i32) -> (i32, i32) {
    %c0_i32 = arith.constant 0 : i32
    %c0_i32_0 = arith.constant 0 : i32
    return %arg0, %c0_i32 : i32, i32
  }
}

</mosaic_0001>

<bundles_post_ra>
// kernel: rmha_forward.7
= control target key start
LH: loop header
LB: loop body
LE: loop exit
PB: predicated region body
PF: predicated region fallthrough
CT: control target
= control target key end

     0   :  { %vm19_vm0 = vcmask 261120   ;;  %v150_v0 = vmov 0.0   ;;  %vm151_vm1 = vmmov 0   ;;  %vm118_vm2 = vcmask 257024   ;;  %s195_s1 = inlined_call_operand.vmem [shape: bf16[32,32], index: 1, kind: input, shape index: {}]   ;;  %s196_s0 = inlined_call_operand.vmem [shape: bf16[16,32], index: 0, kind: input, shape index: {}]   ;;  %s197_s2 = inlined_call_operand.vmem [shape: f32[1,32], index: 2, kind: input, shape index: {}]   ;;  %s198_s3 = inlined_call_operand.vmem [shape: bf16[16,32], index: 3, kind: output, shape index: {}]  }
   0x1   :  { %137 = vmatprep.subr.bf16.mxu0 %v150_v0  ;;  %v147_v1 = vld [vmem:[%s195_s1] sm:$0xff]   ;;  %141 = vmatprep.mubr.msk.bf16.mxu0 %vm151_vm1, %v150_v0  ;;  %20 = vst.msk [vmem:[#allocation2] sm:$0xff] %vm19_vm0, %v150_v0  ;;  %21 = vst.msk [vmem:[#allocation2 + $0x8] sm:$0xff] %vm19_vm0, %v150_v0  ;;  %v148_v2 = vld [vmem:[%s195_s1 + $0x8] sm:$0xff]  }
   0x2   :  { %138 = vmatpush3.bf16.msra.mxu0 %v147_v1  ;;  %v149_v3 = vld [vmem:[%s196_s0] sm:$0xff]  }
   0x3   :  { %139 = vmatprep.subr.bf16.mxu0 %v150_v0  ;;  %v129_v12 = vld [vmem:[%s197_s2] ss:$0 sm:$0xff] }
   0x6   :  { %140 = vmatpush3.bf16.msra.mxu0 %v148_v2 }
   0x8   :  { %v22_v4 = vld [vmem:[#allocation2] sm:$0xff]  ;;  %v23_v6 = vld [vmem:[#allocation2 + $0x8] sm:$0xff] }
   0x9   :  { %142 = vmatmul.mubr.msk.bf16.vlgmr.msra.gmra.mrb[0].mxu0 %vm19_vm0, %v149_v3 }
  0xdc   :  { %v85_v5 = vpop.f32.mrb[0].mxu0 }
  0xdd   :  { %v92_v7 = vadd.f32 %v85_v5, %v22_v4  ;;  %v143_v8 = vpop.f32.mrb[1].mxu0 }
  0xde   :  { %v88_v9 = vpop.f32.mrb[2].mxu0 }
  0xdf   :  { %94 = vst.msk [vmem:[#allocation2] sm:$0xff] %vm19_vm0, %v92_v7  ;;  %v93_v10 = vadd.f32 %v88_v9, %v23_v6  ;;  %v144_v11 = vpop.f32.mrb[3].mxu0 }
  0xe1   :  { %95 = vst.msk [vmem:[#allocation2 + $0x8] sm:$0xff] %vm19_vm0, %v93_v10 }
  0xe6   :  { %v99_v13 = vld [vmem:[#allocation2] sm:$0xff] }
  0xe7   :  { %v108_v14 = vadd.f32 %v129_v12, %v99_v13 }
  0xe8   :  { %v100_v15 = vld [vmem:[#allocation2 + $0x8] sm:$0xff] }
  0xe9   :  { %v132_v16 = vpack.c.bf16 %v108_v14, %v108_v14  ;;  %v109_v17 = vadd.f32 %v129_v12, %v100_v15 }
  0xeb   :  { %119 = vst.msk [vmem:[%s198_s3] sm:$0xf] %vm118_vm2, %v132_v16  ;;  %v133_v18 = vpack.c.bf16 %v109_v17, %v109_v17 }
  0xed   :  { %120 = vst.msk [vmem:[%s198_s3 + $0x4] sm:$0xf] %vm118_vm2, %v133_v18 }

// kernel: rmha_forward.9
= control target key start
LH: loop header
LB: loop body
LE: loop exit
PB: predicated region body
PF: predicated region fallthrough
CT: control target
= control target key end

     0   :  { %vm19_vm0 = vcmask 261120   ;;  %v200_v1 = vmov 0.0   ;;  %vm23_vm1 = vcmask 259072   ;;  %vm158_vm2 = vcmask 257024   ;;  %s258_s1 = inlined_call_operand.vmem [shape: bf16[32,32], index: 1, kind: input, shape index: {}]   ;;  %s259_s0 = inlined_call_operand.vmem [shape: bf16[30,32], index: 0, kind: input, shape index: {}]   ;;  %s260_s2 = inlined_call_operand.vmem [shape: f32[1,32], index: 2, kind: input, shape index: {}]   ;;  %s261_s3 = inlined_call_operand.vmem [shape: bf16[30,32], index: 3, kind: output, shape index: {}]  }
   0x1   :  { %v196_v0 = vld [vmem:[%s258_s1] sm:$0xff]   ;;  %22 = vst.msk [vmem:[#allocation2 + $0x10] sm:$0xff] %vm19_vm0, %v200_v1  ;;  %20 = vst.msk [vmem:[#allocation2] sm:$0xff] %vm19_vm0, %v200_v1  ;;  %v197_v2 = vld [vmem:[%s258_s1 + $0x8] sm:$0xff]   ;;  %vm162_vm3 = vcmask 256000  }
   0x2   :  { %21 = vst.msk [vmem:[#allocation2 + $0x8] sm:$0xff] %vm19_vm0, %v200_v1  ;;  %187 = vmatprep.subr.bf16.mxu0 %v196_v0  ;;  %v198_v3 = vld [vmem:[%s259_s0] sm:$0xff]   ;;  %v199_v4 = vld [vmem:[%s259_s0 + $0x8] sm:$0x7f]  }
   0x3   :  { %188 = vmatpush3.bf16.msra.mxu0 %v196_v0  ;;  %191 = vmatprep.mubr.msk.bf16.mxu0 %vm19_vm0, %v198_v3  ;;  %24 = vst.msk [vmem:[#allocation2 + $0x18] sm:$0x3f] %vm23_vm1, %v200_v1  ;;  %v174_v17 = vld [vmem:[%s260_s2] ss:$0 sm:$0xff] }
   0x4   :  { %189 = vmatprep.subr.bf16.mxu0 %v197_v2 }
   0x7   :  { %190 = vmatpush3.bf16.msra.mxu0 %v197_v2 }
   0x8   :  { %v27_v5 = vld [vmem:[#allocation2 + $0x10] sm:$0xff]  ;;  %v25_v6 = vld [vmem:[#allocation2] sm:$0xff] }
   0x9   :  { %v26_v11 = vld [vmem:[#allocation2 + $0x8] sm:$0xff] }
   0xa   :  { %192 = vmatmul.mubr.msk.bf16.vlgmr.msra.gmra.mrb[0].mxu0 %vm19_vm0, %v199_v4  ;;  %v28_v8 = vld [vmem:[#allocation2 + $0x18] sm:$0x3f] }
  0xdd   :  { %v193_v7 = vpop.f32.mrb[0].mxu0 }
  0xde   :  { %v117_v9 = vadd.f32 %v193_v7, %v27_v5  ;;  %v100_v10 = vpop.f32.mrb[1].mxu0 }
  0xdf   :  { %v115_v12 = vadd.f32 %v100_v10, %v25_v6  ;;  %v194_v13 = vpop.f32.mrb[2].mxu0 }
  0xe0   :  { %121 = vst.msk [vmem:[#allocation2 + $0x10] sm:$0xff] %vm19_vm0, %v117_v9  ;;  %v118_v14 = vadd.f32 %v194_v13, %v28_v8  ;;  %v103_v15 = vpop.f32.mrb[3].mxu0 }
  0xe1   :  { %119 = vst.msk [vmem:[#allocation2] sm:$0xff] %vm19_vm0, %v115_v12  ;;  %v116_v16 = vadd.f32 %v103_v15, %v26_v11 }
  0xe2   :  { %123 = vst.msk [vmem:[#allocation2 + $0x18] sm:$0x3f] %vm23_vm1, %v118_v14 }
  0xe3   :  { %120 = vst.msk [vmem:[#allocation2 + $0x8] sm:$0xff] %vm19_vm0, %v116_v16 }
  0xe7   :  { %v129_v18 = vld [vmem:[#allocation2 + $0x10] sm:$0xff] }
  0xe8   :  { %v140_v19 = vadd.f32 %v174_v17, %v129_v18  ;;  %v127_v20 = vld [vmem:[#allocation2] sm:$0xff] }
  0xe9   :  { %v138_v21 = vadd.f32 %v174_v17, %v127_v20  ;;  %v130_v22 = vld [vmem:[#allocation2 + $0x18] sm:$0x3f] }
  0xea   :  { %v181_v23 = vpack.c.bf16 %v140_v19, %v140_v19  ;;  %v141_v24 = vadd.f32 %v174_v17, %v130_v22  ;;  %v128_v25 = vld [vmem:[#allocation2 + $0x8] sm:$0xff] }
  0xeb   :  { %v179_v26 = vpack.c.bf16 %v138_v21, %v138_v21  ;;  %v139_v27 = vadd.f32 %v174_v17, %v128_v25 }
  0xec   :  { %161 = vst.msk [vmem:[%s261_s3 + $0x8] sm:$0xf] %vm158_vm2, %v181_v23  ;;  %v182_v28 = vpack.c.bf16 %v141_v24, %v141_v24 }
  0xed   :  { %159 = vst.msk [vmem:[%s261_s3] sm:$0xf] %vm158_vm2, %v179_v26  ;;  %v180_v29 = vpack.c.bf16 %v139_v27, %v139_v27 }
  0xee   :  { %163 = vst.msk [vmem:[%s261_s3 + $0xc] sm:$0x7] %vm162_vm3, %v182_v28 }
  0xef   :  { %160 = vst.msk [vmem:[%s261_s3 + $0x4] sm:$0xf] %vm158_vm2, %v180_v29 }

// kernel: rmha_forward.11
= control target key start
LH: loop header
LB: loop body
LE: loop exit
PB: predicated region body
PF: predicated region fallthrough
CT: control target
= control target key end

     0   :  { %v177_v1 = vmov 0.0   ;;  %vm178_vm0 = vmmov 0   ;;  %vm20_vm1 = vcmask 261120   ;;  %s233_s0 = inlined_call_operand.vmem [shape: bf16[16,32], index: 0, kind: input, shape index: {}]   ;;  %s234_s1 = inlined_call_operand.vmem [shape: bf16[32,32], index: 1, kind: input, shape index: {}]   ;;  %s235_s2 = inlined_call_operand.vmem [shape: f32[1,32], index: 2, kind: input, shape index: {}]   ;;  %s236_s3 = inlined_call_operand.hbm [shape: f32[16,32], index: 3, kind: output, shape index: {}]  }
   0x1   :  { %v150_v0 = vld [vmem:[%s234_s1] sm:$0xff]   ;;  %137 = vmatprep.subr.bf16.mxu0 %v177_v1  ;;  %v151_v2 = vld [vmem:[%s234_s1 + $0x8] sm:$0xff]   ;;  %141 = vmatprep.mubr.msk.bf16.mxu0 %vm178_vm0, %v177_v1  ;;  %21 = vst.msk [vmem:[#allocation2] sm:$0xff] %vm20_vm1, %v177_v1  ;;  %22 = vst.msk [vmem:[#allocation2 + $0x8] sm:$0xff] %vm20_vm1, %v177_v1 }
   0x2   :  { %138 = vmatpush3.bf16.msra.mxu0 %v150_v0 }
   0x3   :  { %139 = vmatprep.subr.bf16.mxu0 %v177_v1 }
   0x4   :  { %8 = vsyncpa [#allocation4], 0  ;;  %v152_v3 = vld [vmem:[%s233_s0] sm:$0xff]   ;;  %s179_s0 = smov [#allocation3]  }
   0x5   :  { %v133_v12 = vld [vmem:[%s235_s2] ss:$0 sm:$0xff]  ;;  %s118_s19 = sshll.u32 %s179_s0, 4  ;;  %s119_s19 = int_to_ptr.vmem [resolvable:$true] %s118_s19 }
   0x6   :  { %140 = vmatpush3.bf16.msra.mxu0 %v151_v2  ;;  %s153_s20 = scalar_lea.vmem %s119_s19, 256  ;;  %p158_p1 = scmp.lt.s32.totalorder %s119_s19, %s119_s19 }
   0x7   :  { %p154_p0 = scmp.ne.s32.totalorder %s119_s19, %s153_s20  ;;  %p159_p2 = scmp.lt.s32.totalorder %s153_s20, %s153_s20 }
   0x8   :  { %v23_v4 = vld [vmem:[#allocation2] sm:$0xff]  ;;  %v24_v6 = vld [vmem:[#allocation2 + $0x8] sm:$0xff] }
   0x9   :  { %142 = vmatmul.mubr.msk.bf16.vlgmr.msra.gmra.mrb[0].mxu0 %vm20_vm1, %v152_v3  ;;  %p160_p3 = por %p159_p2, %p158_p1 }
   0xb   :  { %p161_p4 = pnand %p160_p3, %p154_p0 }
  0xdc   :  { %v86_v5 = vpop.f32.mrb[0].mxu0 }
  0xdd   :  { %v93_v7 = vadd.f32 %v86_v5, %v23_v4  ;;  %v143_v8 = vpop.f32.mrb[1].mxu0 }
  0xde   :  { %v89_v9 = vpop.f32.mrb[2].mxu0 }
  0xdf   :  { %95 = vst.msk [vmem:[#allocation2] sm:$0xff] %vm20_vm1, %v93_v7  ;;  %v94_v10 = vadd.f32 %v89_v9, %v24_v6  ;;  %v144_v11 = vpop.f32.mrb[3].mxu0 }
  0xe1   :  { %96 = vst.msk [vmem:[#allocation2 + $0x8] sm:$0xff] %vm20_vm1, %v94_v10 }
  0xe6   :  { %v100_v13 = vld [vmem:[#allocation2] sm:$0xff] }
  0xe7   :  { %v109_v14 = vadd.f32 %v133_v12, %v100_v13 }
  0xe8   :  { %v101_v15 = vld [vmem:[#allocation2 + $0x8] sm:$0xff] }
  0xe9   :  { %v110_v16 = vadd.f32 %v133_v12, %v101_v15  ;;  %111 = vst.msk [vmem:[#allocation3] sm:$0xff] %vm20_vm1, %v109_v14 }
  0xeb   :  { %112 = vst.msk [vmem:[#allocation3 + $0x8] sm:$0xff] %vm20_vm1, %v110_v16 }
  0xec   :  { %164 = shalt.err (!%p161_p4)
}
  0xed   :  { %s165_s22 = scalar_lea.hbm %s236_s3, 256 }
  0xee   :  { %p166_p5 = scmp.ne.s32.totalorder %s236_s3, %s165_s22  ;;  %p169_p6 = scmp.lt.u32.totalorder %s165_s22, %s236_s3 }
  0xf0   :  { %p171_p7 = pnand %p169_p6, %p166_p5 }
  0xf2   :  { %174 = shalt.err (!%p171_p7)
}
  0xf3   :  { %s180_s27 = smov 128   ;;  %s181_s28 = smov 8  }
  0xf4   :  { %124 = dma.vmem_to_hbm [thread:$0]  %s119_s19, 256, %s236_s3, [#allocation4], %s180_s27, %s180_s27, %s181_s28  }
  0xf5   :  { %175 = dma.done.wait [#allocation4], 256  }
  0xf6   :  { %176 = vsyncadd [#allocation4], 4294967040 }
  0xf7   :  { %128 = vsyncpa [#allocation4], 1 }

// kernel: rmha_forward.10
= control target key start
LH: loop header
LB: loop body
LE: loop exit
PB: predicated region body
PF: predicated region fallthrough
CT: control target
= control target key end

     0   :  { %s1115_s21 = smov 0   ;;  %s1117_s22 = smov 0   ;;  %s1237_s0 = inlined_call_operand.vmem [shape: bf16[2,4,8,8], index: 0, kind: input, shape index: {}]   ;;  %s1238_s1 = inlined_call_operand.vmem [shape: bf16[2,4,8,8], index: 1, kind: input, shape index: {}]   ;;  %s1239_s2 = inlined_call_operand.vmem [shape: bf16[2,4,8,8], index: 2, kind: input, shape index: {}]   ;;  %s1240_s3 = inlined_call_operand.vmem [shape: bf16[2,4,128,8], index: 3, kind: input, shape index: {}]   ;;  %s1241_s4 = inlined_call_operand.vmem [shape: f32[4,1,8], index: 4, kind: input, shape index: {}]   ;;  %s1242_s5 = inlined_call_operand.vmem [shape: f32[4,1,8], index: 5, kind: input, shape index: {}]   ;;  %s1243_s6 = inlined_call_operand.vmem [shape: bf16[2,4,8,8], index: 6, kind: output, shape index: {}]  }
   0x1   :  { %s1119_s23 = smov 0   ;;  %s1121_s24 = smov 0  }
   0x2   :  { %s1123_s25 = smov 0  }
   0x3 LB: > { %s31_s26 = sadd.s32 1, %s1064_s23  ;;  %s35_s27 = sadd.s32 1, %s1068_s24  ;;  %s1072_s25 = sphi %s1123_s25, %s16_s25   ;;  %s1068_s24 = sphi %s1121_s24, %s1247_s24   ;;  %s1064_s23 = sphi %s1119_s23, %s1246_s23   ;;  %s1060_s22 = sphi %s1117_s22, %s1245_s22   ;;  %s1056_s21 = sphi %s1115_s21, %s1244_s21  }
   0x4   : > { %p33_p0 = scmp.ge.s32.totalorder %s31_s26, 4  ;;  %p904_p1 = scmp.ge.s32.totalorder %s1072_s25, 1 }
   0x5   : > { %p307_p2 = scmp.lt.s32.totalorder %s1072_s25, 9 }
   0x6   : > { %s1249_s26 = smov (%p33_p0, %s31_s26), 0  ;;  %s1251_s27 = smov (!%p33_p0, %s35_s27), %s1068_s24 }
   0x7   : > { %p308_p3 = pnand %p904_p1, %p307_p2  ;;  %p37_p4 = scmp.ge.s32.totalorder %s1251_s27, 2 }
   0x8   : > { %p380_p5 = scmp.lt.s32.totalorder (!%p308_p3), %s1060_s22, 1  ;;  %p382_p6 = scmp.lt.s32.totalorder (!%p308_p3), %s1056_s21, 3  ;;  %v1074_v0 = vmov (!%p308_p3), 0.0   ;;  %vm1075_vm0 = vmmov (!%p308_p3), 0   ;;  %vm518_vm1 = vcmask (!%p308_p3), 64512   ;;  %v586_v26 = vlaneseq (!%p308_p3) }
   0x9   : > { %s1253_s27 = smov (%p37_p4, %s1251_s27), 0  ;;  %311 = sbr.rel (%p308_p3) target bundleno = 1294 (0x50e), region = 44 }
   0xa   : > { %944 = vmatprep.subr.bf16.mxu0 (!%p308_p3), %v1074_v0  ;;  %960 = vmatprep.mubr.msk.bf16.mxu0 (!%p308_p3), %vm1075_vm0, %v1074_v0  ;;  %s1076_s20 = smov (!%p308_p3), 1   ;;  %v587_v27 = vshrl.u32 (!%p308_p3), %v586_v26, 7  ;;  %s1077_s9 = smov (!%p308_p3), 2   ;;  %vm674_vm5 = vcmask (!%p308_p3), 1043456   ;;  %vm719_vm6 = vcmask (!%p308_p3), 60416  }
   0xb   : > { %964 = vmatprep.subr.bf16.mxu1 (!%p308_p3), %v1074_v0  ;;  %966 = vmatprep.mubr.msk.bf16.mxu1 (!%p308_p3), %vm1075_vm0, %v1074_v0 }
   0xc   : > { %v588_v32 = vand.u32 (!%p308_p3), 1, %v587_v27  ;;  %v595_v36 = vand.u32 (!%p308_p3), 2, %v587_v27  ;;  %v602_v43 = vand.u32 (!%p308_p3), 4, %v587_v27 }
   0xe   : > { %vm589_vm2 = vcmp.ne.s32.totalorder (!%p308_p3), %v588_v32, 0  ;;  %vm596_vm3 = vcmp.ne.s32.totalorder (!%p308_p3), %v595_v36, 0  ;;  %vm603_vm4 = vcmp.ne.s32.totalorder (!%p308_p3), %v602_v43, 0 }
  0x10   : > { %s1255_s22 = smov (!%p380_p5, %s1060_s22), 1  ;;  %s1257_s21 = smov (!%p382_p6, %s1056_s21), 3 }
  0x11   : > { %s912_s28 = sshll.u32 %s1255_s22, 6  ;;  %s911_s29 = sshll.u32 %s1257_s21, 4 }
  0x12   : > { %s413_s30 = sadd.s32 %s912_s28, %s911_s29  ;;  %s905_s11 = sshll.u32 %s1255_s22, 2 }
  0x13   : > { %s913_s7 = sshll.u32 %s413_s30, 2  ;;  %s388_s12 = sadd.s32 %s905_s11, %s1257_s21 }
  0x14   : > { %s1160_s10 = scalar_lea.vmem %s1240_s3, %s913_s7  ;;  %s1183_s13 = sshll.u32 %s388_s12, 2 }
  0x15   : > { %v1022_v1 = vld [vmem:[%s1160_s10] sm:$0xff]   ;;  %v1023_v3 = vld [vmem:[%s1160_s10 + $0x8] sm:$0xff]   ;;  %v1024_v5 = vld [vmem:[%s1160_s10 + $0x10] sm:$0xff]   ;;  %s390_s16 = scalar_lea.vmem %s1237_s0, %s1183_s13  ;;  %s421_s19 = scalar_lea.vmem %s1242_s5, %s1257_s21 }
  0x16   : > { %v523_v2 = vsel %vm518_vm1, %v1022_v1, 0  ;;  %v526_v4 = vsel %vm518_vm1, %v1023_v3, 0  ;;  %v529_v6 = vsel %vm518_vm1, %v1024_v5, 0  ;;  %v1025_v7 = vld [vmem:[%s1160_s10 + $0x18] sm:$0xff]   ;;  %v1026_v9 = vld [vmem:[%s1160_s10 + $0x20] sm:$0xff]   ;;  %v1027_v11 = vld [vmem:[%s1160_s10 + $0x28] sm:$0xff]   ;;  %s398_s29 = scalar_lea.vmem %s1238_s1, %s1183_s13  ;;  %s418_s8 = scalar_lea.vmem %s1241_s4, %s1257_s21 }
  0x17   : > { %945 = vmatpush3.bf16.xpose.msra.mxu0 %v523_v2  ;;  %v532_v8 = vsel %vm518_vm1, %v1025_v7, 0  ;;  %v535_v10 = vsel %vm518_vm1, %v1026_v9, 0  ;;  %v538_v12 = vsel %vm518_vm1, %v1027_v11, 0  ;;  %v1028_v13 = vld [vmem:[%s1160_s10 + $0x30] sm:$0xff]   ;;  %v434_v15 = vld [vmem:[%s390_s16] sm:$0xf]  ;;  %s406_s14 = scalar_lea.vmem %s1239_s2, %s1183_s13  ;;  %s432_s17 = scalar_lea.vmem %s1243_s6, %s1183_s13 }
  0x18   : > { %946 = vmatprep.subr.bf16.mxu0 %v1074_v0  ;;  %v541_v14 = vsel %vm518_vm1, %v1028_v13, 0  ;;  %v1029_v16 = vld [vmem:[%s1160_s10 + $0x38] sm:$0xff]   ;;  %v435_v17 = vunpack.c.l.bf16 %v434_v15  ;;  %v917_v18 = vld [vmem:[%s421_s19] ss:$0 sm:$0xff]  ;;  %s1078_s21 = smov 4   ;;  %s1079_s10 = smov 121  }
  0x19   : > { %v544_v19 = vsel %vm518_vm1, %v1029_v16, 0  ;;  %v436_v28 = vld [vmem:[%s398_s29] sm:$0xf] }
  0x1a   : > { %v454_v20 = vadd.f32 %v917_v18, %v435_v17  ;;  %v916_v29 = vld [vmem:[%s418_s8] ss:$0 sm:$0xff]  ;;  %v617_v30 = vsel %vm518_vm1, %v436_v28, 0 }
  0x1b   : > { %v446_v31 = vadd.f32 %v916_v29, %v435_v17  ;;  %965 = vmatpush3.bf16.xpose.msra.mxu1 %v617_v30  ;;  %v437_v54 = vld [vmem:[%s406_s14] sm:$0xf] }
  0x1c   : > { %v455_v21 = vpack.c.bf16 %v454_v20, %v454_v20  ;;  %970 = vmatprep.subr.bf16.mxu1 %v1074_v0  ;;  %v676_v55 = vsel %vm674_vm5, %v437_v54, 0 }
  0x1d   : > { %v447_v33 = vpack.c.bf16 %v446_v31, %v446_v31 }
  0x1f   : > { %947 = vmatpush3.bf16.xpose.msra.mxu0 %v526_v4 }
  0x20   : > { %948 = vmatprep.subr.bf16.mxu0 %v1074_v0 }
  0x22   : > { %967 = vmatmul.mubr.msk.bf16.vlgmr.msra.gmra.mrb[0].mxu1 %vm518_vm1, %v447_v33 }
  0x23   : > { %972 = vmatprep.mubr.msk.bf16.mxu1 %vm1075_vm0, %v1074_v0  ;;  %971 = vmatpush3.bf16.msra.mxu1 %v676_v55 }
  0x27   : > { %949 = vmatpush3.bf16.xpose.msra.mxu0 %v529_v6 }
  0x28   : > { %950 = vmatprep.subr.bf16.mxu0 %v1074_v0 }
  0x2f   : > { %951 = vmatpush3.bf16.xpose.msra.mxu0 %v532_v8 }
  0x30   : > { %952 = vmatprep.subr.bf16.mxu0 %v1074_v0 }
  0x37   : > { %953 = vmatpush3.bf16.xpose.msra.mxu0 %v535_v10 }
  0x38   : > { %954 = vmatprep.subr.bf16.mxu0 %v1074_v0 }
  0x3f   : > { %955 = vmatpush3.bf16.xpose.msra.mxu0 %v538_v12 }
  0x40   : > { %956 = vmatprep.subr.bf16.mxu0 %v1074_v0 }
  0x47   : > { %957 = vmatpush3.bf16.xpose.msra.mxu0 %v541_v14 }
  0x48   : > { %958 = vmatprep.subr.bf16.mxu0 %v1074_v0 }
  0x4f   : > { %959 = vmatpush3.bf16.xpose.msra.mxu0 %v544_v19 }
  0x56   : > { %961 = vmatmul.mubr.msk.bf16.vlgmr.msra.gmra.mrb[0].mxu0 %vm518_vm1, %v455_v21 }
  0xf5   : > { %v653_v39 = vpop.f32.mrb[0].mxu1 }
  0xf6   : > { %v968_v40 = vpop.f32.mrb[1].mxu1 }
  0xf7   : > { %v656_v41 = vpop.f32.mrb[2].mxu1 }
  0xf8   : > { %v969_v42 = vpop.f32.mrb[3].mxu1 }
 0x129   : > { %v580_v22 = vpop.f32.mrb[0].mxu0 }
 0x12a   : > { %591 = vrot.lane.b32.xlu0 %v580_v22, %s1076_s20  ;;  %v962_v23 = vpop.f32.mrb[1].mxu0 }
 0x12b   : > { %v583_v24 = vpop.f32.mrb[2].mxu0 }
 0x12c   : > { %v963_v25 = vpop.f32.mrb[3].mxu0 }
 0x19c   : > { %v592_v34 = vpop.permute.xlu0 %591 }
 0x19d   : > { %v594_v35 = vsel %vm589_vm2, %v592_v34, %v580_v22 }
 0x19e   : > { %598 = vrot.lane.b32.xlu0 %v594_v35, %s1077_s9 }
 0x210   : > { %v599_v37 = vpop.permute.xlu0 %598 }
 0x211   : > { %v601_v38 = vsel %vm596_vm3, %v599_v37, %v594_v35 }
 0x212   : > { %605 = vrot.lane.b32.xlu1 %v601_v38, %s1078_s21 }
 0x284   : > { %v606_v44 = vpop.permute.xlu1 %605 }
 0x285   : > { %v608_v45 = vsel %vm603_vm4, %v606_v44, %v601_v38 }
 0x286   : > { %610 = vrot.lane.b32.xlu1 %v608_v45, %s1079_s10 }
 0x2f8   : > { %v611_v46 = vpop.permute.xlu1 %610 }
 0x2f9   : > { %v654_v47 = vadd.f32 %v653_v39, %v611_v46 }
 0x2fb   : > { %v659_v48 = vsel %vm518_vm1, %v654_v47, -inf }
 0x2fc   : > { %660 = vmax.xlane.f32.xlu0 %v659_v48 }
 0x389   : > { %v661_v49 = vpop.xlane.xlu0 %660 }
 0x38a   : > { %v662_v50 = vsub.f32 %v654_v47, %v661_v49 }
 0x38c   : > { %v663_v51 = vmul.f32 1.442695, %v662_v50 }
 0x38e   : > { %1030 = vpow2.f32 %v663_v51 }
 0x398   : > { %v1031_v52 = vpop.eup %1030 }
 0x399   : > { %v665_v53 = vsel %vm518_vm1, %v1031_v52, 0.0 }
 0x39a   : > { %666 = vadd.xlane.f32.xlu1 %v665_v53 }
 0x427   : > { %v667_v56 = vpop.xlane.xlu1 %666 }
 0x428   : > { %1032 = vrcp.f32 %v667_v56 }
 0x432   : > { %v1033_v57 = vpop.eup %1032 }
 0x433   : > { %v669_v58 = vmul.f32 %v1033_v57, %v1031_v52 }
 0x435   : > { %v670_v59 = vpack.c.bf16 %v669_v58, %v669_v58 }
 0x437   : > { %973 = vmatmul.mubr.msk.bf16.vlgmr.msra.gmra.mrb[4].mxu1 %vm518_vm1, %v670_v59 }
 0x50a   : > { %v712_v60 = vpop.f32.mrb[4].mxu1 }
 0x50b   : > { %v718_v61 = vpack.c.bf16 %v712_v60, %v712_v60  ;;  %v974_v62 = vpop.f32.mrb[5].mxu1 }
 0x50c   : > { %v715_v63 = vpop.f32.mrb[6].mxu1 }
 0x50d   : > { %720 = vst.msk [vmem:[%s432_s17] sm:$0xf] %vm719_vm6, %v718_v61  ;;  %v975_v0 = vpop.f32.mrb[7].mxu1 }
 0x50e PF: > { %s16_s25 = sadd.s32 1, %s1072_s25   ;;  %s1244_s21 = smov %s1064_s23 }
 0x50f   : > { %p13_p7 = scmp.ge.s32.totalorder %s16_s25, 10   ;;  %s1245_s22 = smov %s1068_s24 }
 0x510   : > { %s1246_s23 = smov %s1249_s26  ;;  %s1247_s24 = smov %s1253_s27 }
 0x511   :  { %15 = sbr.rel (!%p13_p7) target bundleno = 3 (0x3), region = 90 }

</bundles_post_ra>
